<compile_context>
chip_gen: v5e
topology: v5e:2x2
jax: 0.10.0
libtpu: 0.0.40
codegen_flags: <defaults>
</compile_context>

<pallas_src>
import jax
import jax.numpy as jnp
from jax.experimental import pallas as pl
from jax.experimental.pallas import tpu as pltpu


# ---------------------------------------------------------------------------
# Helpers
# ---------------------------------------------------------------------------
def _sigmoid_via_tanh(x):
    # sigmoid(x) = 0.5 * (1 + tanh(x/2)): one EUP push instead of
    # exp + add + reciprocal -> roughly halves EUP pressure for the 3 gates.
    return 0.5 * (1.0 + jnp.tanh(0.5 * x))


def _valid_batch_tile(batch, tb):
    if tb is None:
        return batch
    if 0 < tb <= batch and batch % tb == 0 and tb % 8 == 0:
        return tb
    return batch


def _choose_tn(four_h, row_bytes, target_bytes=4 * 1024 * 1024):
    """Largest N-tile that divides 4H, is a multiple of 128, and keeps one
    (P+H, TN) weight block under target_bytes so a 2-deep weight pipeline fits
    even v7x's 64 MiB VMEM."""
    if four_h % 128 != 0:
        return four_h
    tn = four_h
    while tn % 256 == 0 and tn * row_bytes > target_bytes:
        tn //= 2
    return tn


# ---------------------------------------------------------------------------
# Path A: weights resident in VMEM (small / demo configs).
# Grid = (batch tiles,) only; a static loop runs every layer inside one grid
# step, so there is no per-layer grid-step or DMA-descriptor overhead and the
# inter-layer activation never leaves VMEM.
# ---------------------------------------------------------------------------
def _lstm_resident_kernel(x_ref, h0_ref, c0_ref, w_ref, b_ref, hc_ref, cat_ref):
    # x_ref  : (TB, P)        bf16 external input, zero-padded to P lanes
    # h0_ref : (L, TB, H)     f32 initial hidden states
    # c0_ref : (L, TB, H)     f32 initial cell states
    # w_ref  : (L, P+H, 4H)   bf16 stacked [W_ih^T (zero-padded) ; W_hh^T]
    # b_ref  : (L, 1, 4H)     f32 fused bias b_ih + b_hh
    # hc_ref : (L, TB, 2H)    f32 output, [h1 | c1] fused along lanes
    # cat_ref: (TB, P+H)      bf16 VMEM operand slab [activation | h0]
    L, TB, H = h0_ref.shape
    P = cat_ref.shape[1] - H

    cat_ref[:, 0:P] = x_ref[...].astype(cat_ref.dtype)

    # L is small and static -> unrolled loop keeps every index static and lets
    # the scheduler pipeline weight reads / MXU / EUP across layers.
    for l in range(L):
        cat_ref[:, P:P + H] = h0_ref[l].astype(cat_ref.dtype)

        # Single fused MXU matmul (bf16 x bf16 -> f32 accumulate):
        #   gates = [act | h0] @ [[W_ih^T]; [W_hh^T]] + (b_ih + b_hh)
        gates = jnp.dot(cat_ref[...], w_ref[l],
                        preferred_element_type=jnp.float32) + b_ref[l]

        # torch.chunk(4, dim=1) order: i, f, g, o.  All gate/state math in f32.
        i_g = _sigmoid_via_tanh(gates[:, 0 * H:1 * H])
        f_g = _sigmoid_via_tanh(gates[:, 1 * H:2 * H])
        g_g = jnp.tanh(gates[:, 2 * H:3 * H])
        o_g = _sigmoid_via_tanh(gates[:, 3 * H:4 * H])

        c1 = f_g * c0_ref[l].astype(jnp.float32) + i_g * g_g
        h1 = o_g * jnp.tanh(c1)

        # Fused [h1 | c1] store: one wide lane-dense store per layer.
        hc_ref[l] = jnp.concatenate([h1, c1], axis=-1).astype(hc_ref.dtype)

        if l + 1 < L:
            # Next layer's input is h1 (bf16 only in the matmul operand slab;
            # the stored state stays f32).
            cat_ref[:, 0:H] = h1.astype(cat_ref.dtype)
            if P > H:
                # Guard: clear stale external-input lanes.  The zero-padded
                # weight rows already make them inert; this keeps it robust.
                cat_ref[:, H:P] = jnp.zeros((TB, P - H), cat_ref.dtype)


# ---------------------------------------------------------------------------
# Path B: streamed, N-tiled weights (large configs).
# Grid = (batch tiles ["parallel"], layers, 4H/TN weight column tiles).
# Each grid step multiplies the resident (TB, P+H) operand slab by one
# (P+H, TN) weight block; gate columns collect in a (TB, 4H) f32 VMEM scratch
# and the nonlinearity / state update run on the last tile of each layer.
# ---------------------------------------------------------------------------
def _lstm_streaming_kernel(x_ref, h0_ref, c0_ref, w_ref, b_ref, hc_ref,
                           cat_ref, gates_ref):
    l = pl.program_id(1)
    n = pl.program_id(2)
    n_last = pl.num_programs(2) - 1

    TB, H = h0_ref.shape
    P = cat_ref.shape[1] - H
    TN = w_ref.shape[-1]

    @pl.when((l == 0) & (n == 0))
    def _():
        cat_ref[:, 0:P] = x_ref[...].astype(cat_ref.dtype)

    @pl.when(n == 0)
    def _():
        cat_ref[:, P:P + H] = h0_ref[...].astype(cat_ref.dtype)

    off = pl.multiple_of(n * TN, TN)
    gates_ref[:, pl.ds(off, TN)] = (
        jnp.dot(cat_ref[...], w_ref[...], preferred_element_type=jnp.float32)
        + b_ref[...])

    @pl.when(n == n_last)
    def _():
        gates = gates_ref[...]
        i_g = _sigmoid_via_tanh(gates[:, 0 * H:1 * H])
        f_g = _sigmoid_via_tanh(gates[:, 1 * H:2 * H])
        g_g = jnp.tanh(gates[:, 2 * H:3 * H])
        o_g = _sigmoid_via_tanh(gates[:, 3 * H:4 * H])

        c1 = f_g * c0_ref[...].astype(jnp.float32) + i_g * g_g
        h1 = o_g * jnp.tanh(c1)

        hc_ref[...] = jnp.concatenate([h1, c1], axis=-1).astype(hc_ref.dtype)

        cat_ref[:, 0:H] = h1.astype(cat_ref.dtype)
        if P > H:
            cat_ref[:, H:P] = jnp.zeros((TB, P - H), cat_ref.dtype)


# ---------------------------------------------------------------------------
# One-time parameter preparation (hoisted out of the hot path)
# ---------------------------------------------------------------------------
def prepare_stacked_params(params, input_size, hidden_size,
                           weight_dtype=jnp.bfloat16):
    """Pre-transpose, pad, bf16-cast and stack per-layer weights / fuse biases.

    Returns:
      w_all: (L, P+H, 4H) weight_dtype; rows [0:in_sz] = W_ih^T (zero-padded to
             P rows), rows [P:P+H] = W_hh^T, where P = max(input_size, hidden).
      b_all: (L, 1, 4H) float32 fused bias b_ih + b_hh.
    """
    H = hidden_size
    P = max(input_size, hidden_size)
    w_list, b_list = [], []
    for i, p in enumerate(params):
        in_sz = input_size if i == 0 else H
        w = jnp.zeros((P + H, 4 * H), weight_dtype)
        w = w.at[:in_sz, :].set(jnp.transpose(p["w_ih"]).astype(weight_dtype))
        w = w.at[P:, :].set(jnp.transpose(p["w_hh"]).astype(weight_dtype))
        w_list.append(w)
        b_list.append((p["b_ih"] + p["b_hh"]).reshape(1, 4 * H)
                      .astype(jnp.float32))
    return jnp.stack(w_list), jnp.stack(b_list)


# ---------------------------------------------------------------------------
# Wrappers
# ---------------------------------------------------------------------------
def _forward_resident(x_pad, h0_all, c0_all, w_all, b_all, tb):
    L, B, H = h0_all.shape
    P = w_all.shape[1] - H
    TB = _valid_batch_tile(B, tb)
    nb = B // TB
    itemsize = jnp.dtype(w_all.dtype).itemsize
    w_bytes = int(w_all.size) * itemsize
    vmem_limit = int(min(max(32 * 1024 * 1024, 2 * w_bytes + (8 << 20)),
                         64 * 1024 * 1024))

    hc = pl.pallas_call(
        _lstm_resident_kernel,
        out_shape=jax.ShapeDtypeStruct((L, B, 2 * H), h0_all.dtype),
        grid_spec=pltpu.PrefetchScalarGridSpec(
            num_scalar_prefetch=0,
            grid=(nb,),
            in_specs=[
                pl.BlockSpec((TB, P), lambda b: (b, 0)),                 # x
                pl.BlockSpec((L, TB, H), lambda b: (0, b, 0)),           # h0
                pl.BlockSpec((L, TB, H), lambda b: (0, b, 0)),           # c0
                pl.BlockSpec((L, P + H, 4 * H), lambda b: (0, 0, 0)),    # w
                pl.BlockSpec((L, 1, 4 * H), lambda b: (0, 0, 0)),        # b
            ],
            out_specs=pl.BlockSpec((L, TB, 2 * H), lambda b: (0, b, 0)),
            scratch_shapes=[pltpu.VMEM((TB, P + H), w_all.dtype)],
        ),
        compiler_params=pltpu.CompilerParams(
            dimension_semantics=("parallel",),     # batch tiles -> megacore
            vmem_limit_bytes=vmem_limit,
        ),
    )(x_pad, h0_all, c0_all, w_all, b_all)
    return hc[..., :H], hc[..., H:]


def _forward_streaming(x_pad, h0_all, c0_all, w_all, b_all, tb, tn):
    L, B, H = h0_all.shape
    P = w_all.shape[1] - H
    four_h = 4 * H
    itemsize = jnp.dtype(w_all.dtype).itemsize
    if tn is None or tn <= 0 or four_h % tn != 0:
        tn = _choose_tn(four_h, (P + H) * itemsize)
    n_tiles = four_h // tn
    TB = _valid_batch_tile(B, tb)
    nb = B // TB

    w_blk_bytes = (P + H) * tn * itemsize
    vmem_limit = int(min(max(32 * 1024 * 1024, 4 * w_blk_bytes + (8 << 20)),
                         64 * 1024 * 1024))

    hc = pl.pallas_call(
        _lstm_streaming_kernel,
        out_shape=jax.ShapeDtypeStruct((L, B, 2 * H), h0_all.dtype),
        grid_spec=pltpu.PrefetchScalarGridSpec(
            num_scalar_prefetch=0,
            grid=(nb, L, n_tiles),
            in_specs=[
                pl.BlockSpec((TB, P), lambda b, l, n: (b, 0)),            # x
                pl.BlockSpec((None, TB, H), lambda b, l, n: (l, b, 0)),   # h0
                pl.BlockSpec((None, TB, H), lambda b, l, n: (l, b, 0)),   # c0
                pl.BlockSpec((None, P + H, tn), lambda b, l, n: (l, 0, n)),
                pl.BlockSpec((None, 1, tn), lambda b, l, n: (l, 0, n)),
            ],
            out_specs=pl.BlockSpec((None, TB, 2 * H),
                                   lambda b, l, n: (l, b, 0)),
            scratch_shapes=[
                pltpu.VMEM((TB, P + H), w_all.dtype),    # [act | h0] operand
                pltpu.VMEM((TB, 4 * H), jnp.float32),    # gate accumulator
            ],
        ),
        compiler_params=pltpu.CompilerParams(
            dimension_semantics=("parallel", "arbitrary", "arbitrary"),
            vmem_limit_bytes=vmem_limit,
        ),
    )(x_pad, h0_all, c0_all, w_all, b_all)
    return hc[..., :H], hc[..., H:]


def stacked_lstm_cell_forward(x, state, stacked_params, *, tb=None, tn=None,
                              weight_resident_bytes=6 * 1024 * 1024):
    """StackedLSTMCell.forward (dropout p=0 identity; layernorm=False path).

    x: (B, input_size); state: (h0, c0), each (L, B, H) or (B, H).
    Returns (h1_all, c1_all), each (L, B, H).
    """
    w_all, b_all = stacked_params
    h0_all, c0_all = state
    if h0_all.ndim == 2:
        h0_all = h0_all[None]
        c0_all = c0_all[None]
    L, B, H = h0_all.shape
    P = w_all.shape[1] - H
    I = x.shape[1]
    x_pad = x if I == P else jnp.pad(x, ((0, 0), (0, P - I)))
    x_pad = x_pad.astype(w_all.dtype)

    w_bytes = int(w_all.size) * jnp.dtype(w_all.dtype).itemsize
    if w_bytes <= weight_resident_bytes:
        return _forward_resident(x_pad, h0_all, c0_all, w_all, b_all, tb)
    return _forward_streaming(x_pad, h0_all, c0_all, w_all, b_all, tb, tn)


# ---------------------------------------------------------------------------
# Pure-JAX reference
# ---------------------------------------------------------------------------
def _ref_forward(x, state, params, compute_dtype=jnp.float32):
    """With compute_dtype=float32 this is the exact module-semantics reference;
    with bfloat16 it mirrors the kernel's mixed precision (bf16 matmul
    operands, f32 accumulation and f32 gate / cell-state math)."""
    def q(a):
        return a.astype(compute_dtype).astype(jnp.float32)

    h0_all, c0_all = state
    H = h0_all.shape[-1]
    out = q(x)
    hs, cs = [], []
    for i, p in enumerate(params):
        gates = (out @ q(p["w_ih"]).T + p["b_ih"]
                 + q(h0_all[i]) @ q(p["w_hh"]).T + p["b_hh"])
        i_g = jax.nn.sigmoid(gates[:, 0 * H:1 * H])
        f_g = jax.nn.sigmoid(gates[:, 1 * H:2 * H])
        g_g = jnp.tanh(gates[:, 2 * H:3 * H])
        o_g = jax.nn.sigmoid(gates[:, 3 * H:4 * H])
        c1 = f_g * c0_all[i] + i_g * g_g
        h1 = o_g * jnp.tanh(c1)
        hs.append(h1)
        cs.append(c1)
        out = q(h1)
    return jnp.stack(hs), jnp.stack(cs)


if __name__ == "__main__":
    root = jax.random.PRNGKey(0)

    def make_case(key, batch, input_size, hidden_size, num_layers):
        params = []
        for layer in range(num_layers):
            in_sz = input_size if layer == 0 else hidden_size
            key, k1, k2, k3, k4 = jax.random.split(key, 5)
            params.append({
                "w_ih": jax.random.normal(k1, (4 * hidden_size, in_sz),
                                          jnp.float32),
                "w_hh": jax.random.normal(k2, (4 * hidden_size, hidden_size),
                                          jnp.float32),
                "b_ih": jax.random.normal(k3, (4 * hidden_size,), jnp.float32),
                "b_hh": jax.random.normal(k4, (4 * hidden_size,), jnp.float32),
            })
        key, kx, kh, kc = jax.random.split(key, 4)
        x = jax.random.normal(kx, (batch, input_size), jnp.float32)
        h0 = jax.random.normal(kh, (num_layers, batch, hidden_size),
                               jnp.float32)
        c0 = jax.random.normal(kc, (num_layers, batch, hidden_size),
                               jnp.float32)
        return key, params, x, h0, c0

    # --- Case 1: small demo config -> resident-weights path ----------------
    B1, I1, H1, L1 = 8, 16, 32, 3
    root, params1, x1, h01, c01 = make_case(root, B1, I1, H1, L1)
    stacked1 = prepare_stacked_params(params1, I1, H1)          # bf16 weights
    h1_all, c1_all = stacked_lstm_cell_forward(x1, (h01, c01), stacked1)
    h1_all = jax.block_until_ready(h1_all)
    c1_all = jax.block_until_ready(c1_all)
    assert h1_all.shape == (L1, B1, H1) and c1_all.shape == (L1, B1, H1)

    # Strict check against a reference with matching (bf16-operand) numerics.
    h_ref, c_ref = _ref_forward(x1, (h01, c01), params1,
                                compute_dtype=jnp.bfloat16)
    assert jnp.allclose(h1_all, h_ref, atol=2e-2, rtol=2e-2)
    assert jnp.allclose(c1_all, c_ref, atol=2e-2, rtol=2e-2)
    # Sanity vs exact f32 module semantics (bf16 weights add bounded noise).
    h32, c32 = _ref_forward(x1, (h01, c01), params1)
    assert float(jnp.mean(jnp.abs(h1_all - h32))) < 5e-2
    assert float(jnp.mean(jnp.abs(c1_all - c32))) < 5e-2

    # --- Case 2: lane-aligned config forced down the streaming path --------
    B2, I2, H2, L2 = 8, 192, 128, 2
    root, params2, x2, h02, c02 = make_case(root, B2, I2, H2, L2)
    stacked2 = prepare_stacked_params(params2, I2, H2)
    h2_all, c2_all = stacked_lstm_cell_forward(
        x2, (h02, c02), stacked2, tn=256, weight_resident_bytes=0)
    h2_all = jax.block_until_ready(h2_all)
    c2_all = jax.block_until_ready(c2_all)
    assert h2_all.shape == (L2, B2, H2) and c2_all.shape == (L2, B2, H2)

    h_ref2, c_ref2 = _ref_forward(x2, (h02, c02), params2,
                                  compute_dtype=jnp.bfloat16)
    assert jnp.allclose(h2_all, h_ref2, atol=2e-2, rtol=2e-2)
    assert jnp.allclose(c2_all, c_ref2, atol=2e-2, rtol=2e-2)

    print("KERNEL_OK")
</pallas_src>

<mosaic_0001>
module attributes {stable_mosaic.version = 11 : i64} {
  func.func @_lstm_resident_kernel(%arg0: i32, %arg1: memref<8x32xbf16, #tpu.memory_space<vmem>>, %arg2: memref<3x8x32xf32, #tpu.memory_space<vmem>>, %arg3: memref<3x8x32xf32, #tpu.memory_space<vmem>>, %arg4: memref<3x64x128xbf16, #tpu.memory_space<vmem>>, %arg5: memref<3x1x128xf32, #tpu.memory_space<vmem>>, %arg6: memref<3x8x64xf32, #tpu.memory_space<vmem>>, %arg7: memref<8x64xbf16, #tpu.memory_space<vmem>>) attributes {dimension_semantics = [#tpu.dimension_semantics<parallel>], iteration_bounds = array<i64: 1>, scalar_prefetch = 0 : i64, scratch_operands = 1 : i64, tpu.core_type = #tpu.core_type<tc>, window_params = [{transform_indices = @transform_0, window_bounds = array<i64: 8, 32>}, {transform_indices = @transform_1, window_bounds = array<i64: 3, 8, 32>}, {transform_indices = @transform_2, window_bounds = array<i64: 3, 8, 32>}, {pipeline_mode = #tpu.pipeline_mode<synchronous>, transform_indices = @transform_3, window_bounds = array<i64: 3, 64, 128>}, {pipeline_mode = #tpu.pipeline_mode<synchronous>, transform_indices = @transform_4, window_bounds = array<i64: 3, 1, 128>}, {transform_indices = @transform_5, window_bounds = array<i64: 3, 8, 64>}]} {
    %c0 = arith.constant 0 : index
    %c0_0 = arith.constant 0 : index
    %0 = vector.load %arg1[%c0, %c0_0] : memref<8x32xbf16, #tpu.memory_space<vmem>>, vector<8x32xbf16>
    %c0_1 = arith.constant 0 : index
    %c0_2 = arith.constant 0 : index
    %1 = vector.load %arg7[%c0_1, %c0_2] : memref<8x64xbf16, #tpu.memory_space<vmem>>, vector<8x32xbf16>
    tpu.vector_store %arg7[%c0_1, %c0_2], %0 {strides = array<i32>} : memref<8x64xbf16, #tpu.memory_space<vmem>>, vector<8x32xbf16>,
    %c0_3 = arith.constant 0 : index
    %c0_4 = arith.constant 0 : index
    %c0_5 = arith.constant 0 : index
    %2 = vector.load %arg2[%c0_3, %c0_4, %c0_5] : memref<3x8x32xf32, #tpu.memory_space<vmem>>, vector<1x8x32xf32>
    %3 = vector.shape_cast %2 : vector<1x8x32xf32> to vector<8x32xf32>
    %4 = arith.truncf %3 : vector<8x32xf32> to vector<8x32xbf16>
    %c0_6 = arith.constant 0 : index
    %c32 = arith.constant 32 : index
    %5 = vector.load %arg7[%c0_6, %c32] : memref<8x64xbf16, #tpu.memory_space<vmem>>, vector<8x32xbf16>
    tpu.vector_store %arg7[%c0_6, %c32], %4 {strides = array<i32>} : memref<8x64xbf16, #tpu.memory_space<vmem>>, vector<8x32xbf16>,
    %c0_7 = arith.constant 0 : index
    %c0_8 = arith.constant 0 : index
    %6 = vector.load %arg7[%c0_7, %c0_8] : memref<8x64xbf16, #tpu.memory_space<vmem>>, vector<8x64xbf16>
    %c0_9 = arith.constant 0 : index
    %c0_10 = arith.constant 0 : index
    %c0_11 = arith.constant 0 : index
    %7 = vector.load %arg4[%c0_9, %c0_10, %c0_11] : memref<3x64x128xbf16, #tpu.memory_space<vmem>>, vector<1x64x128xbf16>
    %8 = vector.shape_cast %7 : vector<1x64x128xbf16> to vector<64x128xbf16>
    %cst = arith.constant dense<0.000000e+00> : vector<8x128xf32>
    %9 = tpu.matmul %6, %8, %cst {dimension_numbers = #tpu.dot_dimension_numbers<[1], [0], [0], [1], [0, 0, 1, 1], [], []>} : vector<8x64xbf16>, vector<64x128xbf16>, vector<8x128xf32> -> vector<8x128xf32>
    %c0_12 = arith.constant 0 : index
    %c0_13 = arith.constant 0 : index
    %c0_14 = arith.constant 0 : index
    %10 = vector.load %arg5[%c0_12, %c0_13, %c0_14] : memref<3x1x128xf32, #tpu.memory_space<vmem>>, vector<1x1x128xf32>
    %11 = vector.shape_cast %10 : vector<1x1x128xf32> to vector<1x128xf32>
    %12 = vector.broadcast %11 : vector<1x128xf32> to vector<8x128xf32>
    %13 = arith.addf %9, %12 : vector<8x128xf32>
    %14 = vector.extract_strided_slice %13 {offsets = [0, 0], sizes = [8, 32], strides = [1, 1]} : vector<8x128xf32> to vector<8x32xf32>
    %cst_15 = arith.constant 5.000000e-01 : f32
    %15 = vector.broadcast %cst_15 : f32 to vector<8x32xf32>
    %16 = arith.mulf %15, %14 : vector<8x32xf32>
    %17 = math.tanh %16 : vector<8x32xf32>
    %cst_16 = arith.constant 1.000000e+00 : f32
    %18 = vector.broadcast %cst_16 : f32 to vector<8x32xf32>
    %19 = arith.addf %18, %17 : vector<8x32xf32>
    %cst_17 = arith.constant 5.000000e-01 : f32
    %20 = vector.broadcast %cst_17 : f32 to vector<8x32xf32>
    %21 = arith.mulf %20, %19 : vector<8x32xf32>
    %22 = vector.extract_strided_slice %13 {offsets = [0, 32], sizes = [8, 32], strides = [1, 1]} : vector<8x128xf32> to vector<8x32xf32>
    %cst_18 = arith.constant 5.000000e-01 : f32
    %23 = vector.broadcast %cst_18 : f32 to vector<8x32xf32>
    %24 = arith.mulf %23, %22 : vector<8x32xf32>
    %25 = math.tanh %24 : vector<8x32xf32>
    %cst_19 = arith.constant 1.000000e+00 : f32
    %26 = vector.broadcast %cst_19 : f32 to vector<8x32xf32>
    %27 = arith.addf %26, %25 : vector<8x32xf32>
    %cst_20 = arith.constant 5.000000e-01 : f32
    %28 = vector.broadcast %cst_20 : f32 to vector<8x32xf32>
    %29 = arith.mulf %28, %27 : vector<8x32xf32>
    %30 = vector.extract_strided_slice %13 {offsets = [0, 64], sizes = [8, 32], strides = [1, 1]} : vector<8x128xf32> to vector<8x32xf32>
    %31 = math.tanh %30 : vector<8x32xf32>
    %32 = vector.extract_strided_slice %13 {offsets = [0, 96], sizes = [8, 32], strides = [1, 1]} : vector<8x128xf32> to vector<8x32xf32>
    %cst_21 = arith.constant 5.000000e-01 : f32
    %33 = vector.broadcast %cst_21 : f32 to vector<8x32xf32>
    %34 = arith.mulf %33, %32 : vector<8x32xf32>
    %35 = math.tanh %34 : vector<8x32xf32>
    %cst_22 = arith.constant 1.000000e+00 : f32
    %36 = vector.broadcast %cst_22 : f32 to vector<8x32xf32>
    %37 = arith.addf %36, %35 : vector<8x32xf32>
    %cst_23 = arith.constant 5.000000e-01 : f32
    %38 = vector.broadcast %cst_23 : f32 to vector<8x32xf32>
    %39 = arith.mulf %38, %37 : vector<8x32xf32>
    %c0_24 = arith.constant 0 : index
    %c0_25 = arith.constant 0 : index
    %c0_26 = arith.constant 0 : index
    %40 = vector.load %arg3[%c0_24, %c0_25, %c0_26] : memref<3x8x32xf32, #tpu.memory_space<vmem>>, vector<1x8x32xf32>
    %41 = vector.shape_cast %40 : vector<1x8x32xf32> to vector<8x32xf32>
    %42 = arith.mulf %29, %41 : vector<8x32xf32>
    %43 = arith.mulf %21, %31 : vector<8x32xf32>
    %44 = arith.addf %42, %43 : vector<8x32xf32>
    %45 = math.tanh %44 : vector<8x32xf32>
    %46 = arith.mulf %39, %45 : vector<8x32xf32>
    %47 = tpu.concatenate %46, %44 in 1 : vector<8x32xf32>, vector<8x32xf32> -> vector<8x64xf32>
    %c0_27 = arith.constant 0 : index
    %c0_28 = arith.constant 0 : index
    %c0_29 = arith.constant 0 : index
    %48 = vector.load %arg6[%c0_27, %c0_28, %c0_29] : memref<3x8x64xf32, #tpu.memory_space<vmem>>, vector<1x8x64xf32>
    %49 = vector.shape_cast %48 : vector<1x8x64xf32> to vector<8x64xf32>
    %50 = vector.shape_cast %47 : vector<8x64xf32> to vector<1x8x64xf32>
    tpu.vector_store %arg6[%c0_27, %c0_28, %c0_29], %50 {strides = array<i32>} : memref<3x8x64xf32, #tpu.memory_space<vmem>>, vector<1x8x64xf32>,
    %51 = arith.truncf %46 : vector<8x32xf32> to vector<8x32xbf16>
    %c0_30 = arith.constant 0 : index
    %c0_31 = arith.constant 0 : index
    %52 = vector.load %arg7[%c0_30, %c0_31] : memref<8x64xbf16, #tpu.memory_space<vmem>>, vector<8x32xbf16>
    tpu.vector_store %arg7[%c0_30, %c0_31], %51 {strides = array<i32>} : memref<8x64xbf16, #tpu.memory_space<vmem>>, vector<8x32xbf16>,
    %c1 = arith.constant 1 : index
    %c0_32 = arith.constant 0 : index
    %c0_33 = arith.constant 0 : index
    %53 = vector.load %arg2[%c1, %c0_32, %c0_33] : memref<3x8x32xf32, #tpu.memory_space<vmem>>, vector<1x8x32xf32>
    %54 = vector.shape_cast %53 : vector<1x8x32xf32> to vector<8x32xf32>
    %55 = arith.truncf %54 : vector<8x32xf32> to vector<8x32xbf16>
    %c0_34 = arith.constant 0 : index
    %c32_35 = arith.constant 32 : index
    %56 = vector.load %arg7[%c0_34, %c32_35] : memref<8x64xbf16, #tpu.memory_space<vmem>>, vector<8x32xbf16>
    tpu.vector_store %arg7[%c0_34, %c32_35], %55 {strides = array<i32>} : memref<8x64xbf16, #tpu.memory_space<vmem>>, vector<8x32xbf16>,
    %c0_36 = arith.constant 0 : index
    %c0_37 = arith.constant 0 : index
    %57 = vector.load %arg7[%c0_36, %c0_37] : memref<8x64xbf16, #tpu.memory_space<vmem>>, vector<8x64xbf16>
    %c1_38 = arith.constant 1 : index
    %c0_39 = arith.constant 0 : index
    %c0_40 = arith.constant 0 : index
    %58 = vector.load %arg4[%c1_38, %c0_39, %c0_40] : memref<3x64x128xbf16, #tpu.memory_space<vmem>>, vector<1x64x128xbf16>
    %59 = vector.shape_cast %58 : vector<1x64x128xbf16> to vector<64x128xbf16>
    %cst_41 = arith.constant dense<0.000000e+00> : vector<8x128xf32>
    %60 = tpu.matmul %57, %59, %cst_41 {dimension_numbers = #tpu.dot_dimension_numbers<[1], [0], [0], [1], [0, 0, 1, 1], [], []>} : vector<8x64xbf16>, vector<64x128xbf16>, vector<8x128xf32> -> vector<8x128xf32>
    %c1_42 = arith.constant 1 : index
    %c0_43 = arith.constant 0 : index
    %c0_44 = arith.constant 0 : index
    %61 = vector.load %arg5[%c1_42, %c0_43, %c0_44] : memref<3x1x128xf32, #tpu.memory_space<vmem>>, vector<1x1x128xf32>
    %62 = vector.shape_cast %61 : vector<1x1x128xf32> to vector<1x128xf32>
    %63 = vector.broadcast %62 : vector<1x128xf32> to vector<8x128xf32>
    %64 = arith.addf %60, %63 : vector<8x128xf32>
    %65 = vector.extract_strided_slice %64 {offsets = [0, 0], sizes = [8, 32], strides = [1, 1]} : vector<8x128xf32> to vector<8x32xf32>
    %cst_45 = arith.constant 5.000000e-01 : f32
    %66 = vector.broadcast %cst_45 : f32 to vector<8x32xf32>
    %67 = arith.mulf %66, %65 : vector<8x32xf32>
    %68 = math.tanh %67 : vector<8x32xf32>
    %cst_46 = arith.constant 1.000000e+00 : f32
    %69 = vector.broadcast %cst_46 : f32 to vector<8x32xf32>
    %70 = arith.addf %69, %68 : vector<8x32xf32>
    %cst_47 = arith.constant 5.000000e-01 : f32
    %71 = vector.broadcast %cst_47 : f32 to vector<8x32xf32>
    %72 = arith.mulf %71, %70 : vector<8x32xf32>
    %73 = vector.extract_strided_slice %64 {offsets = [0, 32], sizes = [8, 32], strides = [1, 1]} : vector<8x128xf32> to vector<8x32xf32>
    %cst_48 = arith.constant 5.000000e-01 : f32
    %74 = vector.broadcast %cst_48 : f32 to vector<8x32xf32>
    %75 = arith.mulf %74, %73 : vector<8x32xf32>
    %76 = math.tanh %75 : vector<8x32xf32>
    %cst_49 = arith.constant 1.000000e+00 : f32
    %77 = vector.broadcast %cst_49 : f32 to vector<8x32xf32>
    %78 = arith.addf %77, %76 : vector<8x32xf32>
    %cst_50 = arith.constant 5.000000e-01 : f32
    %79 = vector.broadcast %cst_50 : f32 to vector<8x32xf32>
    %80 = arith.mulf %79, %78 : vector<8x32xf32>
    %81 = vector.extract_strided_slice %64 {offsets = [0, 64], sizes = [8, 32], strides = [1, 1]} : vector<8x128xf32> to vector<8x32xf32>
    %82 = math.tanh %81 : vector<8x32xf32>
    %83 = vector.extract_strided_slice %64 {offsets = [0, 96], sizes = [8, 32], strides = [1, 1]} : vector<8x128xf32> to vector<8x32xf32>
    %cst_51 = arith.constant 5.000000e-01 : f32
    %84 = vector.broadcast %cst_51 : f32 to vector<8x32xf32>
    %85 = arith.mulf %84, %83 : vector<8x32xf32>
    %86 = math.tanh %85 : vector<8x32xf32>
    %cst_52 = arith.constant 1.000000e+00 : f32
    %87 = vector.broadcast %cst_52 : f32 to vector<8x32xf32>
    %88 = arith.addf %87, %86 : vector<8x32xf32>
    %cst_53 = arith.constant 5.000000e-01 : f32
    %89 = vector.broadcast %cst_53 : f32 to vector<8x32xf32>
    %90 = arith.mulf %89, %88 : vector<8x32xf32>
    %c1_54 = arith.constant 1 : index
    %c0_55 = arith.constant 0 : index
    %c0_56 = arith.constant 0 : index
    %91 = vector.load %arg3[%c1_54, %c0_55, %c0_56] : memref<3x8x32xf32, #tpu.memory_space<vmem>>, vector<1x8x32xf32>
    %92 = vector.shape_cast %91 : vector<1x8x32xf32> to vector<8x32xf32>
    %93 = arith.mulf %80, %92 : vector<8x32xf32>
    %94 = arith.mulf %72, %82 : vector<8x32xf32>
    %95 = arith.addf %93, %94 : vector<8x32xf32>
    %96 = math.tanh %95 : vector<8x32xf32>
    %97 = arith.mulf %90, %96 : vector<8x32xf32>
    %98 = tpu.concatenate %97, %95 in 1 : vector<8x32xf32>, vector<8x32xf32> -> vector<8x64xf32>
    %c1_57 = arith.constant 1 : index
    %c0_58 = arith.constant 0 : index
    %c0_59 = arith.constant 0 : index
    %99 = vector.load %arg6[%c1_57, %c0_58, %c0_59] : memref<3x8x64xf32, #tpu.memory_space<vmem>>, vector<1x8x64xf32>
    %100 = vector.shape_cast %99 : vector<1x8x64xf32> to vector<8x64xf32>
    %101 = vector.shape_cast %98 : vector<8x64xf32> to vector<1x8x64xf32>
    tpu.vector_store %arg6[%c1_57, %c0_58, %c0_59], %101 {strides = array<i32>} : memref<3x8x64xf32, #tpu.memory_space<vmem>>, vector<1x8x64xf32>,
    %102 = arith.truncf %97 : vector<8x32xf32> to vector<8x32xbf16>
    %c0_60 = arith.constant 0 : index
    %c0_61 = arith.constant 0 : index
    %103 = vector.load %arg7[%c0_60, %c0_61] : memref<8x64xbf16, #tpu.memory_space<vmem>>, vector<8x32xbf16>
    tpu.vector_store %arg7[%c0_60, %c0_61], %102 {strides = array<i32>} : memref<8x64xbf16, #tpu.memory_space<vmem>>, vector<8x32xbf16>,
    %c2 = arith.constant 2 : index
    %c0_62 = arith.constant 0 : index
    %c0_63 = arith.constant 0 : index
    %104 = vector.load %arg2[%c2, %c0_62, %c0_63] : memref<3x8x32xf32, #tpu.memory_space<vmem>>, vector<1x8x32xf32>
    %105 = vector.shape_cast %104 : vector<1x8x32xf32> to vector<8x32xf32>
    %106 = arith.truncf %105 : vector<8x32xf32> to vector<8x32xbf16>
    %c0_64 = arith.constant 0 : index
    %c32_65 = arith.constant 32 : index
    %107 = vector.load %arg7[%c0_64, %c32_65] : memref<8x64xbf16, #tpu.memory_space<vmem>>, vector<8x32xbf16>
    tpu.vector_store %arg7[%c0_64, %c32_65], %106 {strides = array<i32>} : memref<8x64xbf16, #tpu.memory_space<vmem>>, vector<8x32xbf16>,
    %c0_66 = arith.constant 0 : index
    %c0_67 = arith.constant 0 : index
    %108 = vector.load %arg7[%c0_66, %c0_67] : memref<8x64xbf16, #tpu.memory_space<vmem>>, vector<8x64xbf16>
    %c2_68 = arith.constant 2 : index
    %c0_69 = arith.constant 0 : index
    %c0_70 = arith.constant 0 : index
    %109 = vector.load %arg4[%c2_68, %c0_69, %c0_70] : memref<3x64x128xbf16, #tpu.memory_space<vmem>>, vector<1x64x128xbf16>
    %110 = vector.shape_cast %109 : vector<1x64x128xbf16> to vector<64x128xbf16>
    %cst_71 = arith.constant dense<0.000000e+00> : vector<8x128xf32>
    %111 = tpu.matmul %108, %110, %cst_71 {dimension_numbers = #tpu.dot_dimension_numbers<[1], [0], [0], [1], [0, 0, 1, 1], [], []>} : vector<8x64xbf16>, vector<64x128xbf16>, vector<8x128xf32> -> vector<8x128xf32>
    %c2_72 = arith.constant 2 : index
    %c0_73 = arith.constant 0 : index
    %c0_74 = arith.constant 0 : index
    %112 = vector.load %arg5[%c2_72, %c0_73, %c0_74] : memref<3x1x128xf32, #tpu.memory_space<vmem>>, vector<1x1x128xf32>
    %113 = vector.shape_cast %112 : vector<1x1x128xf32> to vector<1x128xf32>
    %114 = vector.broadcast %113 : vector<1x128xf32> to vector<8x128xf32>
    %115 = arith.addf %111, %114 : vector<8x128xf32>
    %116 = vector.extract_strided_slice %115 {offsets = [0, 0], sizes = [8, 32], strides = [1, 1]} : vector<8x128xf32> to vector<8x32xf32>
    %cst_75 = arith.constant 5.000000e-01 : f32
    %117 = vector.broadcast %cst_75 : f32 to vector<8x32xf32>
    %118 = arith.mulf %117, %116 : vector<8x32xf32>
    %119 = math.tanh %118 : vector<8x32xf32>
    %cst_76 = arith.constant 1.000000e+00 : f32
    %120 = vector.broadcast %cst_76 : f32 to vector<8x32xf32>
    %121 = arith.addf %120, %119 : vector<8x32xf32>
    %cst_77 = arith.constant 5.000000e-01 : f32
    %122 = vector.broadcast %cst_77 : f32 to vector<8x32xf32>
    %123 = arith.mulf %122, %121 : vector<8x32xf32>
    %124 = vector.extract_strided_slice %115 {offsets = [0, 32], sizes = [8, 32], strides = [1, 1]} : vector<8x128xf32> to vector<8x32xf32>
    %cst_78 = arith.constant 5.000000e-01 : f32
    %125 = vector.broadcast %cst_78 : f32 to vector<8x32xf32>
    %126 = arith.mulf %125, %124 : vector<8x32xf32>
    %127 = math.tanh %126 : vector<8x32xf32>
    %cst_79 = arith.constant 1.000000e+00 : f32
    %128 = vector.broadcast %cst_79 : f32 to vector<8x32xf32>
    %129 = arith.addf %128, %127 : vector<8x32xf32>
    %cst_80 = arith.constant 5.000000e-01 : f32
    %130 = vector.broadcast %cst_80 : f32 to vector<8x32xf32>
    %131 = arith.mulf %130, %129 : vector<8x32xf32>
    %132 = vector.extract_strided_slice %115 {offsets = [0, 64], sizes = [8, 32], strides = [1, 1]} : vector<8x128xf32> to vector<8x32xf32>
    %133 = math.tanh %132 : vector<8x32xf32>
    %134 = vector.extract_strided_slice %115 {offsets = [0, 96], sizes = [8, 32], strides = [1, 1]} : vector<8x128xf32> to vector<8x32xf32>
    %cst_81 = arith.constant 5.000000e-01 : f32
    %135 = vector.broadcast %cst_81 : f32 to vector<8x32xf32>
    %136 = arith.mulf %135, %134 : vector<8x32xf32>
    %137 = math.tanh %136 : vector<8x32xf32>
    %cst_82 = arith.constant 1.000000e+00 : f32
    %138 = vector.broadcast %cst_82 : f32 to vector<8x32xf32>
    %139 = arith.addf %138, %137 : vector<8x32xf32>
    %cst_83 = arith.constant 5.000000e-01 : f32
    %140 = vector.broadcast %cst_83 : f32 to vector<8x32xf32>
    %141 = arith.mulf %140, %139 : vector<8x32xf32>
    %c2_84 = arith.constant 2 : index
    %c0_85 = arith.constant 0 : index
    %c0_86 = arith.constant 0 : index
    %142 = vector.load %arg3[%c2_84, %c0_85, %c0_86] : memref<3x8x32xf32, #tpu.memory_space<vmem>>, vector<1x8x32xf32>
    %143 = vector.shape_cast %142 : vector<1x8x32xf32> to vector<8x32xf32>
    %144 = arith.mulf %131, %143 : vector<8x32xf32>
    %145 = arith.mulf %123, %133 : vector<8x32xf32>
    %146 = arith.addf %144, %145 : vector<8x32xf32>
    %147 = math.tanh %146 : vector<8x32xf32>
    %148 = arith.mulf %141, %147 : vector<8x32xf32>
    %149 = tpu.concatenate %148, %146 in 1 : vector<8x32xf32>, vector<8x32xf32> -> vector<8x64xf32>
    %c2_87 = arith.constant 2 : index
    %c0_88 = arith.constant 0 : index
    %c0_89 = arith.constant 0 : index
    %150 = vector.load %arg6[%c2_87, %c0_88, %c0_89] : memref<3x8x64xf32, #tpu.memory_space<vmem>>, vector<1x8x64xf32>
    %151 = vector.shape_cast %150 : vector<1x8x64xf32> to vector<8x64xf32>
    %152 = vector.shape_cast %149 : vector<8x64xf32> to vector<1x8x64xf32>
    tpu.vector_store %arg6[%c2_87, %c0_88, %c0_89], %152 {strides = array<i32>} : memref<3x8x64xf32, #tpu.memory_space<vmem>>, vector<1x8x64xf32>,
    return
  }
  func.func @transform_0(%arg0: i32) -> (i32, i32) {
    %c0_i32 = arith.constant 0 : i32
    %c0_i32_0 = arith.constant 0 : i32
    return %arg0, %c0_i32 : i32, i32
  }
  func.func @transform_1(%arg0: i32) -> (i32, i32, i32) {
    %c0_i32 = arith.constant 0 : i32
    %c0_i32_0 = arith.constant 0 : i32
    %c0_i32_1 = arith.constant 0 : i32
    return %c0_i32, %arg0, %c0_i32_0 : i32, i32, i32
  }
  func.func @transform_2(%arg0: i32) -> (i32, i32, i32) {
    %c0_i32 = arith.constant 0 : i32
    %c0_i32_0 = arith.constant 0 : i32
    %c0_i32_1 = arith.constant 0 : i32
    return %c0_i32, %arg0, %c0_i32_0 : i32, i32, i32
  }
  func.func @transform_3(%arg0: i32) -> (i32, i32, i32) {
    %c0_i32 = arith.constant 0 : i32
    %c0_i32_0 = arith.constant 0 : i32
    %c0_i32_1 = arith.constant 0 : i32
    %c0_i32_2 = arith.constant 0 : i32
    return %c0_i32, %c0_i32_0, %c0_i32_1 : i32, i32, i32
  }
  func.func @transform_4(%arg0: i32) -> (i32, i32, i32) {
    %c0_i32 = arith.constant 0 : i32
    %c0_i32_0 = arith.constant 0 : i32
    %c0_i32_1 = arith.constant 0 : i32
    %c0_i32_2 = arith.constant 0 : i32
    return %c0_i32, %c0_i32_0, %c0_i32_1 : i32, i32, i32
  }
  func.func @transform_5(%arg0: i32) -> (i32, i32, i32) {
    %c0_i32 = arith.constant 0 : i32
    %c0_i32_0 = arith.constant 0 : i32
    %c0_i32_1 = arith.constant 0 : i32
    return %c0_i32, %arg0, %c0_i32_0 : i32, i32, i32
  }
}

</mosaic_0001>

<bundles_post_ra>
// kernel: tpu_custom_call.1
= control target key start
LH: loop header
LB: loop body
LE: loop exit
PB: predicated region body
PF: predicated region fallthrough
CT: control target
= control target key end

     0   :  { %10 = vsyncpa [#allocation4], 0  ;;  %s749_s0 = inlined_call_operand.hbm [shape: bf16[8,32], index: 0, kind: input, shape index: {}]   ;;  %s750_s1 = inlined_call_operand.hbm [shape: f32[3,8,32], index: 1, kind: input, shape index: {}]   ;;  %s751_s2 = inlined_call_operand.hbm [shape: f32[3,8,32], index: 2, kind: input, shape index: {}]   ;;  %s752_s3 = inlined_call_operand.hbm [shape: bf16[3,64,128], index: 3, kind: input, shape index: {}]   ;;  %s753_s4 = inlined_call_operand.vmem [shape: f32[3,1,128], index: 4, kind: input, shape index: {}]   ;;  %s754_s5 = inlined_call_operand.hbm [shape: f32[3,8,64], index: 5, kind: output, shape index: {}]  }
   0x1   :  { %11 = vsyncpa [#allocation7], 0 }
   0x2   :  { %12 = vsyncpa [#allocation10], 0  ;;  %s29_s20 = sshll.u32 %s750_s1, 4  ;;  %s30_s20 = int_to_ptr.hbm [resolvable:$true] %s29_s20 }
   0x3   :  { %13 = vsyncpa [#allocation5], 0  ;;  %s635_s21 = smov [#allocation6]   ;;  %s19_s25 = sshll.u32 %s749_s0, 4  ;;  %s20_s25 = int_to_ptr.hbm [resolvable:$true] %s19_s25 }
   0x4   :  { %s31_s22 = sshll.u32 %s635_s21, 4  ;;  %s636_s26 = smov 128   ;;  %s32_s22 = int_to_ptr.vmem [resolvable:$true] %s31_s22 }
   0x5   :  { %s637_s27 = smov 8   ;;  %s638_s28 = smov [#allocation3]  }
   0x6   :  { %37 = dma.hbm_to_vmem [thread:$0]  %s30_s20, 384, %s32_s22, [#allocation7], %s636_s26, %s636_s26, %s637_s27  }
   0x7   :  { %s21_s29 = sshll.u32 %s638_s28, 4  ;;  %s42_s6 = sshll.u32 %s751_s2, 4  ;;  %s22_s29 = int_to_ptr.vmem [resolvable:$true] %s21_s29  ;;  %s43_s6 = int_to_ptr.hbm [resolvable:$true] %s42_s6 }
   0x8   :  { %24 = dma.hbm_to_vmem [thread:$0]  %s20_s25, 64, %s22_s29, [#allocation4]  }
   0x9   :  { %s55_s0 = sshll.u32 %s752_s3, 4  ;;  %s639_s9 = smov [#allocation8]   ;;  %s56_s0 = int_to_ptr.hbm [resolvable:$true] %s55_s0 }
   0xa   :  { %s44_s10 = sshll.u32 %s639_s9, 4  ;;  %s640_s11 = smov [#allocation9]   ;;  %s45_s10 = int_to_ptr.vmem [resolvable:$true] %s44_s10 }
   0xb   :  { %50 = dma.hbm_to_vmem [thread:$0]  %s43_s6, 384, %s45_s10, [#allocation7], %s636_s26, %s636_s26, %s637_s27  }
   0xc   :  { %s57_s12 = sshll.u32 %s640_s11, 4  ;;  %s641_s13 = smov 64   ;;  %s58_s12 = int_to_ptr.vmem [resolvable:$true] %s57_s12 }
   0xd   :  { %s642_s2 = smov 4  }
   0xe   :  { %63 = dma.hbm_to_vmem [thread:$0]  %s56_s0, 1536, %s58_s12, [#allocation10], %s641_s13, %s641_s13, %s642_s2  }
   0xf   :  { %627 = dma.done.wait [#allocation4], 64  }
  0x10   :  { %628 = vsyncadd [#allocation4], 4294967232 }
  0x11   :  { %629 = dma.done.wait [#allocation7], 768  }
  0x12   :  { %630 = vsyncadd [#allocation7], 4294966528 }
  0x13   :  { %631 = dma.done.wait [#allocation10], 1536  }
  0x14   :  { %632 = vsyncadd [#allocation10], 4294965760  ;;  %v86_v0 = vld [vmem:[#allocation6] sm:$0xff]  ;;  %v467_v1 = vld [vmem:[#allocation9 + $0x18] sm:$0xff]  ;;  %s643_s3 = smov 32   ;;  %vm84_vm0 = vcmask 257024  }
  0x15   :  { %v87_v2 = vpack.c.bf16 %v86_v0, %v86_v0  ;;  %139 = vmatpush.bf16.msra.mxu0 %v467_v1  ;;  %v466_v3 = vld [vmem:[#allocation9 + $0x10] sm:$0xff]  ;;  %v83_v4 = vld [vmem:[#allocation3] sm:$0xf]  ;;  %v464_v6 = vld [vmem:[#allocation9] sm:$0xff]  ;;  %vm92_vm1 = vcmask 519424   ;;  %vm131_vm2 = vcmask 523264  }
  0x16   :  { %85 = vst.msk [vmem:[#allocation2] sm:$0xf] %vm84_vm0, %v83_v4  ;;  %v465_v5 = vld [vmem:[#allocation9 + $0x8] sm:$0xff]  ;;  %v189_v21 = vld [vmem:[#allocation6 + $0x8] sm:$0xff]  ;;  %v470_v29 = vld [vmem:[#allocation9 + $0x30] sm:$0xff]  ;;  %vm179_vm3 = vcmask 261120  }
  0x17   :  { %89 = vrot.lane.b32.xlu0 %v87_v2, %s643_s3  ;;  %v153_v7 = vld [vmem:[#allocation8] sm:$0xff]  ;;  %v190_v22 = vpack.c.bf16 %v189_v21, %v189_v21  ;;  %v471_v28 = vld [vmem:[#allocation9 + $0x38] sm:$0xff]  ;;  %v468_v34 = vld [vmem:[#allocation9 + $0x20] sm:$0xff]  ;;  %s396_s23 = sshll.u32 %s754_s5, 4  ;;  %s397_s23 = int_to_ptr.hbm [resolvable:$true] %s396_s23 }
  0x18   :  { %155 = vrot.lane.b32.xlu1 %v153_v7, %s643_s3  ;;  %v486_v10 = vld [vmem:[%s753_s4] ss:$0 sm:$0xff]  ;;  %242 = vmatpush.bf16.msra.mxu1 %v471_v28  ;;  %v257_v35 = vld [vmem:[#allocation8 + $0x8] sm:$0xff]  ;;  %v487_v39 = vld [vmem:[%s753_s4 + $0x1] ss:$0 sm:$0xff] }
  0x19   :  { %140 = vmatpush.bf16.msra.mxu0 %v466_v3  ;;  %v469_v33 = vld [vmem:[#allocation9 + $0x28] sm:$0xff]  ;;  %v293_v50 = vld [vmem:[#allocation6 + $0x10] sm:$0xff]  ;;  %v475_v57 = vld [vmem:[#allocation9 + $0x58] sm:$0xff] }
  0x1a   :  { %v294_v51 = vpack.c.bf16 %v293_v50, %v293_v50  ;;  %346 = vmatpush.bf16.msra.mxu2 %v475_v57  ;;  %v474_v58 = vld [vmem:[#allocation9 + $0x50] sm:$0xff]  ;;  %v361_v62 = vld [vmem:[#allocation8 + $0x10] sm:$0xff]  ;;  %v473_v63 = vld [vmem:[#allocation9 + $0x48] sm:$0xff] }
  0x1b   :  { %v472_v0 = vld [vmem:[#allocation9 + $0x40] sm:$0xff]  ;;  %v488_v7 = vld [vmem:[%s753_s4 + $0x2] ss:$0 sm:$0xff]  ;;  %s644_s4 = smov [#allocation11]  }
  0x1c   :  { %243 = vmatpush.bf16.msra.mxu1 %v470_v29  ;;  %s394_s20 = sshll.u32 %s644_s4, 4  ;;  %s395_s20 = int_to_ptr.vmem [resolvable:$true] %s394_s20 }
  0x1d   :  { %141 = vmatpush.bf16.msra.mxu0 %v465_v5 }
  0x1e   :  { %347 = vmatpush.bf16.msra.mxu2 %v474_v58 }
  0x20   :  { %244 = vmatpush.bf16.msra.mxu1 %v469_v33 }
  0x21   :  { %142 = vmatpush.bf16.msra.mxu0 %v464_v6 }
  0x22   :  { %348 = vmatpush.bf16.msra.mxu2 %v473_v63 }
  0x24   :  { %245 = vmatpush.bf16.msra.mxu1 %v468_v34 }
  0x26   :  { %349 = vmatpush.bf16.msra.mxu2 %v472_v0 }
  0x89   :  { %v90_v8 = vpop.permute.xlu0 %89 }
  0x8a   :  { %93 = vst.msk [vmem:[#allocation2] sm:$0xf] %vm92_vm1, %v90_v8  ;;  %v156_v23 = vpop.permute.xlu1 %155 }
  0x91   :  { %v94_v9 = vld [vmem:[#allocation2] sm:$0xf] }
  0x92   :  { %427 = vmatmul.msk.bf16.vlgmr.msra.gmra.mxu0 %vm131_vm2, %v94_v9 }
 0x10f   :  { %v144_v11 = vpop.f32.mrf.mxu0 }
 0x110   :  { %v145_v12 = vadd.f32 %v486_v10, %v144_v11 }
 0x112   :  { %489 = vtanh.f32 %v145_v12  ;;  %v148_v15 = vmul.f32 0.5, %v145_v12 }
 0x114   :  { %491 = vtanh.f32 %v148_v15 }
 0x117   :  { %v146_v13 = vpop.f32.mrf.mxu0 }
 0x118   :  { %v490_v14 = vpop.eup %489 }
 0x119   :  { %160 = vrot.lane.b32.xlu0 %v490_v14, %s641_s13 }
 0x11a   :  { %v492_v16 = vpop.eup %491 }
 0x11b   :  { %v150_v17 = vadd.f32 1.0, %v492_v16 }
 0x11d   :  { %v151_v18 = vmul.f32 0.5, %v150_v17 }
 0x11f   :  { %v158_v24 = vmul.f32 %v156_v23, %v151_v18 }
 0x121   :  { %192 = vrot.lane.b32.xlu0 %v190_v22, %s643_s3 }
 0x18b   :  { %v161_v19 = vpop.permute.xlu0 %160 }
 0x18c   :  { %v163_v20 = vmul.f32 %v161_v19, %v151_v18 }
 0x18e   :  { %165 = vrot.lane.b32.xlu1 %v163_v20, %s643_s3 }
 0x193   :  { %v193_v36 = vpop.permute.xlu0 %192 }
 0x200   :  { %v166_v25 = vpop.permute.xlu1 %165 }
 0x201   :  { %v706_v26 = vadd.f32 %v166_v25, %v158_v24 }
 0x203   :  { %493 = vtanh.f32 %v706_v26 }
 0x209   :  { %v494_v27 = vpop.eup %493 }
 0x20a   :  { %171 = vrot.lane.b32.xlu2 %v494_v27, %s641_s13 }
 0x264   :  { %v172_v30 = vpop.permute.xlu2 %171 }
 0x265   :  { %v174_v31 = vmul.f32 %v172_v30, %v151_v18 }
 0x267   :  { %v182_v32 = vpack.c.bf16 %v174_v31, %v174_v31 }
 0x269   :  { %184 = vrot.lane.b32.xlu2 %v182_v32, %s643_s3 }
 0x271   :  { %259 = vrot.lane.b32.xlu2 %v257_v35, %s643_s3 }
 0x2c3   :  { %v185_v37 = vpop.permute.xlu2 %184 }
 0x2c4   :  { %187 = vst.msk [vmem:[#allocation2] sm:$0xf] %vm84_vm0, %v185_v37 }
 0x2c5   :  { %195 = vst.msk [vmem:[#allocation2] sm:$0xf] %vm92_vm1, %v193_v36 }
 0x2cb   :  { %v260_v52 = vpop.permute.xlu2 %259 }
 0x2cc   :  { %v196_v38 = vld [vmem:[#allocation2] sm:$0xf] }
 0x2cd   :  { %445 = vmatmul.msk.bf16.vlgmr.msra.gmra.mxu1 %vm131_vm2, %v196_v38 }
 0x34a   :  { %v247_v40 = vpop.f32.mrf.mxu1 }
 0x34b   :  { %v248_v41 = vadd.f32 %v487_v39, %v247_v40 }
 0x34d   :  { %495 = vtanh.f32 %v248_v41  ;;  %v251_v44 = vmul.f32 0.5, %v248_v41 }
 0x34f   :  { %497 = vtanh.f32 %v251_v44 }
 0x352   :  { %v249_v42 = vpop.f32.mrf.mxu1 }
 0x353   :  { %v496_v43 = vpop.eup %495 }
 0x354   :  { %264 = vrot.lane.b32.xlu1 %v496_v43, %s641_s13 }
 0x355   :  { %v498_v45 = vpop.eup %497 }
 0x356   :  { %v253_v46 = vadd.f32 1.0, %v498_v45 }
 0x358   :  { %v254_v47 = vmul.f32 0.5, %v253_v46 }
 0x35a   :  { %v262_v53 = vmul.f32 %v260_v52, %v254_v47 }
 0x3c6   :  { %v265_v48 = vpop.permute.xlu1 %264 }
 0x3c7   :  { %v267_v49 = vmul.f32 %v265_v48, %v254_v47 }
 0x3c9   :  { %269 = vrot.lane.b32.xlu0 %v267_v49, %s643_s3 }
 0x3d1   :  { %296 = vrot.lane.b32.xlu0 %v294_v51, %s643_s3 }
 0x43b   :  { %v270_v54 = vpop.permute.xlu0 %269 }
 0x43c   :  { %v272_v55 = vadd.f32 %v270_v54, %v262_v53 }
 0x43e   :  { %499 = vtanh.f32 %v272_v55 }
 0x443   :  { %v297_v1 = vpop.permute.xlu0 %296 }
 0x444   :  { %v500_v56 = vpop.eup %499 }
 0x445   :  { %275 = vrot.lane.b32.xlu1 %v500_v56, %s641_s13 }
 0x4b7   :  { %v276_v59 = vpop.permute.xlu1 %275 }
 0x4b8   :  { %v278_v60 = vmul.f32 %v276_v59, %v254_v47 }
 0x4ba   :  { %v286_v61 = vpack.c.bf16 %v278_v60, %v278_v60 }
 0x4bc   :  { %288 = vrot.lane.b32.xlu2 %v286_v61, %s643_s3 }
 0x4c4   :  { %363 = vrot.lane.b32.xlu2 %v361_v62, %s643_s3 }
 0x4cc   :  { %176 = vrot.lane.b32.xlu2 %v174_v31, %s643_s3 }
 0x516   :  { %v289_v2 = vpop.permute.xlu2 %288 }
 0x517   :  { %291 = vst.msk [vmem:[#allocation2] sm:$0xf] %vm84_vm0, %v289_v2 }
 0x518   :  { %299 = vst.msk [vmem:[#allocation2] sm:$0xf] %vm92_vm1, %v297_v1 }
 0x51e   :  { %v364_v3 = vpop.permute.xlu2 %363 }
 0x51f   :  { %v300_v4 = vld [vmem:[#allocation2] sm:$0xf] }
 0x520   :  { %463 = vmatmul.msk.bf16.vlgmr.msra.gmra.mxu2 %vm131_vm2, %v300_v4 }
 0x526   :  { %v177_v5 = vpop.permute.xlu2 %176 }
 0x527   :  { %v180_v6 = vsel %vm179_vm3, %v177_v5, %v706_v26 }
 0x528   :  { %181 = vst.msk [vmem:[#allocation11] sm:$0xff] %vm131_vm2, %v180_v6 }
 0x5a3   :  { %v351_v8 = vpop.f32.mrf.mxu2 }
 0x5a4   :  { %v352_v9 = vadd.f32 %v488_v7, %v351_v8 }
 0x5a6   :  { %501 = vtanh.f32 %v352_v9  ;;  %v355_v12 = vmul.f32 0.5, %v352_v9 }
 0x5a8   :  { %503 = vtanh.f32 %v355_v12 }
 0x5ab   :  { %v353_v10 = vpop.f32.mrf.mxu2 }
 0x5ac   :  { %v502_v11 = vpop.eup %501 }
 0x5ad   :  { %368 = vrot.lane.b32.xlu1 %v502_v11, %s641_s13 }
 0x5ae   :  { %v504_v13 = vpop.eup %503 }
 0x5af   :  { %v357_v14 = vadd.f32 1.0, %v504_v13 }
 0x5b1   :  { %v358_v15 = vmul.f32 0.5, %v357_v14 }
 0x5b3   :  { %v366_v18 = vmul.f32 %v364_v3, %v358_v15 }
 0x61f   :  { %v369_v16 = vpop.permute.xlu1 %368 }
 0x620   :  { %v371_v17 = vmul.f32 %v369_v16, %v358_v15 }
 0x622   :  { %373 = vrot.lane.b32.xlu0 %v371_v17, %s643_s3 }
 0x62a   :  { %280 = vrot.lane.b32.xlu0 %v278_v60, %s643_s3 }
 0x694   :  { %v374_v19 = vpop.permute.xlu0 %373 }
 0x695   :  { %v376_v20 = vadd.f32 %v374_v19, %v366_v18 }
 0x697   :  { %505 = vtanh.f32 %v376_v20 }
 0x69c   :  { %v281_v21 = vpop.permute.xlu0 %280 }
 0x69d   :  { %v506_v22 = vpop.eup %505  ;;  %v283_v23 = vsel %vm179_vm3, %v281_v21, %v272_v55 }
 0x69e   :  { %285 = vst.msk [vmem:[#allocation11 + $0x8] sm:$0xff] %vm131_vm2, %v283_v23  ;;  %379 = vrot.lane.b32.xlu1 %v506_v22, %s641_s13 }
 0x710   :  { %v380_v24 = vpop.permute.xlu1 %379 }
 0x711   :  { %v382_v25 = vmul.f32 %v380_v24, %v358_v15 }
 0x713   :  { %384 = vrot.lane.b32.xlu1 %v382_v25, %s643_s3 }
 0x785   :  { %v385_v26 = vpop.permute.xlu1 %384 }
 0x786   :  { %v387_v27 = vsel %vm179_vm3, %v385_v26, %v376_v20 }
 0x787   :  { %389 = vst.msk [vmem:[#allocation11 + $0x10] sm:$0xff] %vm131_vm2, %v387_v27 }
 0x788   :  { %402 = dma.vmem_to_hbm [thread:$0]  %s395_s20, 384, %s397_s23, [#allocation5], %s636_s26, %s636_s26, %s637_s27  }
 0x789   :  { %633 = dma.done.wait [#allocation5], 384  }
 0x78a   :  { %634 = vsyncadd [#allocation5], 4294966912 }
 0x78b   :  { %407 = vsyncpa [#allocation4], 1 }
 0x78c   :  { %408 = vsyncpa [#allocation7], 1 }
 0x78d   :  { %409 = vsyncpa [#allocation10], 1 }
 0x78e   :  { %410 = vsyncpa [#allocation5], 1 }

</bundles_post_ra>
